<compile_context>
chip_gen: v5e
topology: v5e:2x2
jax: 0.10.0
libtpu: 0.0.40
codegen_flags: <defaults>
</compile_context>

<pallas_src>
import functools

import jax
import jax.numpy as jnp
from jax.experimental import pallas as pl
from jax.experimental.pallas import tpu as pltpu


# ----------------------------------------------------------------------------
# Ball query (ms_query): for each query point take the first `nsample` points
# (in index order) whose squared distance < radius^2; unfilled slots repeat the
# first neighbor found (the query point itself is always in range).
# ----------------------------------------------------------------------------
def ball_query(radius: float, nsample: int, xyz: jnp.ndarray) -> jnp.ndarray:
    # xyz: (B, N, 3) -> idx: (B, N, nsample) int32
    B, N, _ = xyz.shape
    d2 = jnp.sum((xyz[:, :, None, :] - xyz[:, None, :, :]) ** 2, axis=-1)  # (B, N, N)
    within = d2 < radius * radius
    cand = jnp.arange(N, dtype=jnp.int32)
    # key = candidate index for in-range points, shifted past N otherwise, so the
    # `nsample` smallest keys are exactly the first nsample hits in index order.
    key = jnp.where(within, cand[None, None, :], cand[None, None, :] + N)  # (B, N, N)
    neg_vals, _ = jax.lax.top_k(-key, nsample)                             # (B, N, S)
    key_sel = -neg_vals                                                    # ascending
    valid = key_sel < N
    idx = jnp.where(valid, key_sel, key_sel - N)
    first = idx[:, :, 0:1]                          # first hit (query point itself)
    idx = jnp.where(valid, idx, first).astype(jnp.int32)
    return idx                                                             # (B, N, S)


# ----------------------------------------------------------------------------
# Pallas kernel: SharedMLP (two 1x1 conv layers + ReLU) and max-pool over the
# neighbor axis, for one (batch, N-tile) block.  Everything is channel-major so
# the big operands are lane-dense on the point axis (TN).
# ----------------------------------------------------------------------------
def _lse_kernel(g_ref, w1t_ref, b1_ref, w2t_ref, b2_ref, out_ref, *, nsample):
    # g_ref:   (1, S, 3, TN) bf16  centered neighbor coords, channel-major per slot
    # w1t_ref: (C1, 3)  bf16       layer-1 weight (transposed for channel-major matmul)
    # b1_ref:  (C1, 1)  f32
    # w2t_ref: (C2, C1) bf16
    # b2_ref:  (C2, 1)  f32
    # out_ref: (1, C2, TN) f32     max-pooled features, lane-dense on TN
    tn = g_ref.shape[-1]
    c1 = w1t_ref.shape[0]
    w1t = w1t_ref[...]
    w2t = w2t_ref[...]
    # Hoist the lane-broadcast of the layer-1 bias out of the unrolled loop
    # (JAX does not CSE broadcast_in_dim; S iterations -> S broadcasts otherwise).
    b1b = jnp.broadcast_to(b1_ref[...], (c1, tn))

    # relu(. + b2) is monotone nondecreasing, so max-pool commutes with it: keep
    # only the raw layer-2 matmul results in the running max, apply bias + ReLU once.
    m = None
    # S is small (8..32); a static unroll keeps every matmul a clean 2-D MXU op
    # with TN (multiple of 128) on lanes and needs no reshapes/relayouts.
    for s in range(nsample):
        x = g_ref[0, s]                                                    # (3, TN) bf16
        h = jnp.dot(w1t, x, preferred_element_type=jnp.float32) + b1b      # (C1, TN)
        h = jnp.maximum(h, 0.0)
        z = jnp.dot(w2t, h.astype(jnp.bfloat16),
                    preferred_element_type=jnp.float32)                    # (C2, TN)
        m = z if m is None else jnp.maximum(m, z)
    out_ref[0] = jnp.maximum(m + b2_ref[...], 0.0)


def _pick_tile_n(n: int) -> int:
    """Largest lane-dense N tile that divides N; fall back to N for small inputs."""
    if n % 128 != 0:
        return n
    for cand in (1024, 512, 256, 128):
        if n % cand == 0:
            return cand
    return n


def local_spatial_encoding(xyz, idx, w1, b1, w2, b2, *, block_n=None):
    """xyz: (B, N, 3) f32, idx: (B, N, S) int32 -> (B, N, C2 + 1) f32."""
    B, N, _ = xyz.shape
    S = idx.shape[-1]
    c1 = w1.shape[1]
    c2 = w2.shape[1]

    # grouping_operation + center subtraction (data-dependent gather; XLA glue).
    gathered = jax.vmap(lambda pts, ind: pts[ind])(xyz, idx)               # (B, N, S, 3)
    grouped = gathered - xyz[:, :, None, :]                                # (B, N, S, 3)
    # Channel-major per neighbor slot, cast to bf16 for streaming: (B, S, 3, N).
    # The DMA'd block's last dim is the lane-dense point axis; bf16 halves the
    # dominant HBM read and is exactly what the MXU consumes.
    grouped_cm = jnp.transpose(grouped, (0, 2, 3, 1)).astype(jnp.bfloat16)  # (B, S, 3, N)

    tn = _pick_tile_n(N) if block_n is None else block_n
    assert N % tn == 0, (N, tn)

    w1t = w1.T.astype(jnp.bfloat16)                                        # (C1, 3)
    w2t = w2.T.astype(jnp.bfloat16)                                        # (C2, C1)
    b1c = jnp.reshape(b1, (c1, 1)).astype(jnp.float32)
    b2c = jnp.reshape(b2, (c2, 1)).astype(jnp.float32)

    kernel = functools.partial(_lse_kernel, nsample=S)

    pooled_cm = pl.pallas_call(
        kernel,
        out_shape=jax.ShapeDtypeStruct((B, c2, N), jnp.float32),
        grid=(B, N // tn),
        in_specs=[
            pl.BlockSpec((1, S, 3, tn), lambda b, n: (b, 0, 0, n)),
            pl.BlockSpec((c1, 3), lambda b, n: (0, 0)),
            pl.BlockSpec((c1, 1), lambda b, n: (0, 0)),
            pl.BlockSpec((c2, c1), lambda b, n: (0, 0)),
            pl.BlockSpec((c2, 1), lambda b, n: (0, 0)),
        ],
        out_specs=pl.BlockSpec((1, c2, tn), lambda b, n: (b, 0, n)),
        compiler_params=pltpu.CompilerParams(
            dimension_semantics=("parallel", "parallel"),
            vmem_limit_bytes=32 * 1024 * 1024,
        ),
    )(grouped_cm, w1t, b1c, w2t, b2c)

    pooled = jnp.transpose(pooled_cm, (0, 2, 1))                           # (B, N, C2)

    # Density depends only on idx, so it is computed outside the kernel.
    # PyTorch divides by features.shape[-1], which after squeeze+transpose is C2.
    unique_cnt = jnp.sum((idx != idx[:, :, :1]).astype(jnp.float32), axis=2) + 1.0
    density = unique_cnt / float(c2)
    return jnp.concatenate([pooled, density[..., None]], axis=-1)          # (B, N, C2+1)


def lse_forward(xyz, w1, b1, w2, b2, *, radius, nsample):
    """Full module forward: ball query (XLA glue) + fused MLP/max-pool kernel."""
    idx = ball_query(radius, nsample, xyz)
    return local_spatial_encoding(xyz, idx, w1, b1, w2, b2)


# ----------------------------------------------------------------------------
# Pure-JAX reference (mirrors the kernel's bf16-operand / f32-accumulate matmuls).
# ----------------------------------------------------------------------------
def _reference_forward(xyz, idx, w1, b1, w2, b2):
    c2 = w2.shape[1]
    gathered = jax.vmap(lambda pts, ind: pts[ind])(xyz, idx)               # (B, N, S, 3)
    grouped = gathered - xyz[:, :, None, :]
    g = grouped.astype(jnp.bfloat16).astype(jnp.float32)
    w1q = w1.astype(jnp.bfloat16).astype(jnp.float32)
    w2q = w2.astype(jnp.bfloat16).astype(jnp.float32)
    h = jnp.maximum(g @ w1q + b1.reshape(1, 1, 1, -1), 0.0)                # (B, N, S, C1)
    h = h.astype(jnp.bfloat16).astype(jnp.float32)
    h = jnp.maximum(h @ w2q + b2.reshape(1, 1, 1, -1), 0.0)                # (B, N, S, C2)
    pooled = jnp.max(h, axis=2)                                            # (B, N, C2)
    unique_cnt = jnp.sum((idx != idx[:, :, :1]).astype(jnp.float32), axis=2) + 1.0
    density = unique_cnt / float(c2)
    return jnp.concatenate([pooled, density[..., None]], axis=-1)


if __name__ == "__main__":
    key = jax.random.PRNGKey(0)

    # Small-but-representative shapes; N is a multiple of 128 so the kernel gets a
    # lane-dense point tile (the wrapper falls back to TN = N for smaller N).
    B, N, nsample = 2, 256, 8
    radius = 0.4
    mlp = [0, 16, 32]
    mlp = list(mlp)
    mlp[0] += 3                       # module __init__: mlp[0] += 3 (xyz channels)
    c_in, c1, c2 = mlp

    k1, k2, k3, k4, kx = jax.random.split(key, 5)
    # SharedMLP(bn=False): Conv2d(1x1, bias=True) + ReLU per layer.
    w1 = jax.random.normal(k1, (c_in, c1), jnp.float32) / jnp.sqrt(float(c_in))
    b1 = jax.random.normal(k2, (c1,), jnp.float32) * 0.1
    w2 = jax.random.normal(k3, (c1, c2), jnp.float32) / jnp.sqrt(float(c1))
    b2 = jax.random.normal(k4, (c2,), jnp.float32) * 0.1

    xyz = jax.random.uniform(kx, (B, N, 3), jnp.float32)                   # (B, N, 3)

    fwd = jax.jit(functools.partial(lse_forward, radius=radius, nsample=nsample))
    out = jax.block_until_ready(fwd(xyz, w1, b1, w2, b2))

    assert out.shape == (B, N, c2 + 1), out.shape
    assert out.dtype == jnp.float32

    idx = ball_query(radius, nsample, xyz)
    ref = _reference_forward(xyz, idx, w1, b1, w2, b2)
    assert bool(jnp.allclose(out, ref, rtol=2e-3, atol=2e-3)), (
        float(jnp.max(jnp.abs(out - ref))))

    print("KERNEL_OK")
</pallas_src>

<mosaic_0001>
module attributes {stable_mosaic.version = 11 : i64} {
  func.func @_lse_kernel(%arg0: i32, %arg1: i32, %arg2: memref<1x8x3x256xbf16, #tpu.memory_space<vmem>>, %arg3: memref<16x3xbf16, #tpu.memory_space<vmem>>, %arg4: memref<16x1xf32, #tpu.memory_space<vmem>>, %arg5: memref<32x16xbf16, #tpu.memory_space<vmem>>, %arg6: memref<32x1xf32, #tpu.memory_space<vmem>>, %arg7: memref<1x32x256xf32, #tpu.memory_space<vmem>>) attributes {dimension_semantics = [#tpu.dimension_semantics<parallel>, #tpu.dimension_semantics<parallel>], iteration_bounds = array<i64: 2, 1>, scalar_prefetch = 0 : i64, scratch_operands = 0 : i64, tpu.core_type = #tpu.core_type<tc>, window_params = [{transform_indices = @transform_0, window_bounds = array<i64: 1, 8, 3, 256>}, {pipeline_mode = #tpu.pipeline_mode<synchronous>, transform_indices = @transform_1, window_bounds = array<i64: 16, 3>}, {pipeline_mode = #tpu.pipeline_mode<synchronous>, transform_indices = @transform_2, window_bounds = array<i64: 16, 1>}, {pipeline_mode = #tpu.pipeline_mode<synchronous>, transform_indices = @transform_3, window_bounds = array<i64: 32, 16>}, {pipeline_mode = #tpu.pipeline_mode<synchronous>, transform_indices = @transform_4, window_bounds = array<i64: 32, 1>}, {transform_indices = @transform_5, window_bounds = array<i64: 1, 32, 256>}]} {
    %c0 = arith.constant 0 : index
    %c0_0 = arith.constant 0 : index
    %0 = vector.load %arg3[%c0, %c0_0] : memref<16x3xbf16, #tpu.memory_space<vmem>>, vector<16x3xbf16>
    %c0_1 = arith.constant 0 : index
    %c0_2 = arith.constant 0 : index
    %1 = vector.load %arg5[%c0_1, %c0_2] : memref<32x16xbf16, #tpu.memory_space<vmem>>, vector<32x16xbf16>
    %c0_3 = arith.constant 0 : index
    %c0_4 = arith.constant 0 : index
    %2 = vector.load %arg4[%c0_3, %c0_4] : memref<16x1xf32, #tpu.memory_space<vmem>>, vector<16x1xf32>
    %3 = vector.shape_cast %2 : vector<16x1xf32> to vector<16x1xf32>
    %4 = vector.broadcast %3 : vector<16x1xf32> to vector<16x256xf32>
    %c0_5 = arith.constant 0 : index
    %c0_6 = arith.constant 0 : index
    %c0_7 = arith.constant 0 : index
    %c0_8 = arith.constant 0 : index
    %5 = vector.load %arg2[%c0_5, %c0_6, %c0_7, %c0_8] : memref<1x8x3x256xbf16, #tpu.memory_space<vmem>>, vector<1x1x3x256xbf16>
    %6 = vector.shape_cast %5 : vector<1x1x3x256xbf16> to vector<3x256xbf16>
    %cst = arith.constant dense<0.000000e+00> : vector<16x256xf32>
    %7 = tpu.matmul %0, %6, %cst {dimension_numbers = #tpu.dot_dimension_numbers<[1], [0], [0], [1], [0, 0, 1, 1], [], []>} : vector<16x3xbf16>, vector<3x256xbf16>, vector<16x256xf32> -> vector<16x256xf32>
    %8 = arith.addf %7, %4 : vector<16x256xf32>
    %cst_9 = arith.constant 0.000000e+00 : f32
    %9 = vector.broadcast %cst_9 : f32 to vector<16x256xf32>
    %10 = arith.maximumf %8, %9 : vector<16x256xf32>
    %11 = arith.truncf %10 : vector<16x256xf32> to vector<16x256xbf16>
    %cst_10 = arith.constant dense<0.000000e+00> : vector<32x256xf32>
    %12 = tpu.matmul %1, %11, %cst_10 {dimension_numbers = #tpu.dot_dimension_numbers<[1], [0], [0], [1], [0, 0, 1, 1], [], []>} : vector<32x16xbf16>, vector<16x256xbf16>, vector<32x256xf32> -> vector<32x256xf32>
    %c0_11 = arith.constant 0 : index
    %c1 = arith.constant 1 : index
    %c0_12 = arith.constant 0 : index
    %c0_13 = arith.constant 0 : index
    %13 = vector.load %arg2[%c0_11, %c1, %c0_12, %c0_13] : memref<1x8x3x256xbf16, #tpu.memory_space<vmem>>, vector<1x1x3x256xbf16>
    %14 = vector.shape_cast %13 : vector<1x1x3x256xbf16> to vector<3x256xbf16>
    %cst_14 = arith.constant dense<0.000000e+00> : vector<16x256xf32>
    %15 = tpu.matmul %0, %14, %cst_14 {dimension_numbers = #tpu.dot_dimension_numbers<[1], [0], [0], [1], [0, 0, 1, 1], [], []>} : vector<16x3xbf16>, vector<3x256xbf16>, vector<16x256xf32> -> vector<16x256xf32>
    %16 = arith.addf %15, %4 : vector<16x256xf32>
    %cst_15 = arith.constant 0.000000e+00 : f32
    %17 = vector.broadcast %cst_15 : f32 to vector<16x256xf32>
    %18 = arith.maximumf %16, %17 : vector<16x256xf32>
    %19 = arith.truncf %18 : vector<16x256xf32> to vector<16x256xbf16>
    %cst_16 = arith.constant dense<0.000000e+00> : vector<32x256xf32>
    %20 = tpu.matmul %1, %19, %cst_16 {dimension_numbers = #tpu.dot_dimension_numbers<[1], [0], [0], [1], [0, 0, 1, 1], [], []>} : vector<32x16xbf16>, vector<16x256xbf16>, vector<32x256xf32> -> vector<32x256xf32>
    %21 = arith.maximumf %12, %20 : vector<32x256xf32>
    %c0_17 = arith.constant 0 : index
    %c2 = arith.constant 2 : index
    %c0_18 = arith.constant 0 : index
    %c0_19 = arith.constant 0 : index
    %22 = vector.load %arg2[%c0_17, %c2, %c0_18, %c0_19] : memref<1x8x3x256xbf16, #tpu.memory_space<vmem>>, vector<1x1x3x256xbf16>
    %23 = vector.shape_cast %22 : vector<1x1x3x256xbf16> to vector<3x256xbf16>
    %cst_20 = arith.constant dense<0.000000e+00> : vector<16x256xf32>
    %24 = tpu.matmul %0, %23, %cst_20 {dimension_numbers = #tpu.dot_dimension_numbers<[1], [0], [0], [1], [0, 0, 1, 1], [], []>} : vector<16x3xbf16>, vector<3x256xbf16>, vector<16x256xf32> -> vector<16x256xf32>
    %25 = arith.addf %24, %4 : vector<16x256xf32>
    %cst_21 = arith.constant 0.000000e+00 : f32
    %26 = vector.broadcast %cst_21 : f32 to vector<16x256xf32>
    %27 = arith.maximumf %25, %26 : vector<16x256xf32>
    %28 = arith.truncf %27 : vector<16x256xf32> to vector<16x256xbf16>
    %cst_22 = arith.constant dense<0.000000e+00> : vector<32x256xf32>
    %29 = tpu.matmul %1, %28, %cst_22 {dimension_numbers = #tpu.dot_dimension_numbers<[1], [0], [0], [1], [0, 0, 1, 1], [], []>} : vector<32x16xbf16>, vector<16x256xbf16>, vector<32x256xf32> -> vector<32x256xf32>
    %30 = arith.maximumf %21, %29 : vector<32x256xf32>
    %c0_23 = arith.constant 0 : index
    %c3 = arith.constant 3 : index
    %c0_24 = arith.constant 0 : index
    %c0_25 = arith.constant 0 : index
    %31 = vector.load %arg2[%c0_23, %c3, %c0_24, %c0_25] : memref<1x8x3x256xbf16, #tpu.memory_space<vmem>>, vector<1x1x3x256xbf16>
    %32 = vector.shape_cast %31 : vector<1x1x3x256xbf16> to vector<3x256xbf16>
    %cst_26 = arith.constant dense<0.000000e+00> : vector<16x256xf32>
    %33 = tpu.matmul %0, %32, %cst_26 {dimension_numbers = #tpu.dot_dimension_numbers<[1], [0], [0], [1], [0, 0, 1, 1], [], []>} : vector<16x3xbf16>, vector<3x256xbf16>, vector<16x256xf32> -> vector<16x256xf32>
    %34 = arith.addf %33, %4 : vector<16x256xf32>
    %cst_27 = arith.constant 0.000000e+00 : f32
    %35 = vector.broadcast %cst_27 : f32 to vector<16x256xf32>
    %36 = arith.maximumf %34, %35 : vector<16x256xf32>
    %37 = arith.truncf %36 : vector<16x256xf32> to vector<16x256xbf16>
    %cst_28 = arith.constant dense<0.000000e+00> : vector<32x256xf32>
    %38 = tpu.matmul %1, %37, %cst_28 {dimension_numbers = #tpu.dot_dimension_numbers<[1], [0], [0], [1], [0, 0, 1, 1], [], []>} : vector<32x16xbf16>, vector<16x256xbf16>, vector<32x256xf32> -> vector<32x256xf32>
    %39 = arith.maximumf %30, %38 : vector<32x256xf32>
    %c0_29 = arith.constant 0 : index
    %c4 = arith.constant 4 : index
    %c0_30 = arith.constant 0 : index
    %c0_31 = arith.constant 0 : index
    %40 = vector.load %arg2[%c0_29, %c4, %c0_30, %c0_31] : memref<1x8x3x256xbf16, #tpu.memory_space<vmem>>, vector<1x1x3x256xbf16>
    %41 = vector.shape_cast %40 : vector<1x1x3x256xbf16> to vector<3x256xbf16>
    %cst_32 = arith.constant dense<0.000000e+00> : vector<16x256xf32>
    %42 = tpu.matmul %0, %41, %cst_32 {dimension_numbers = #tpu.dot_dimension_numbers<[1], [0], [0], [1], [0, 0, 1, 1], [], []>} : vector<16x3xbf16>, vector<3x256xbf16>, vector<16x256xf32> -> vector<16x256xf32>
    %43 = arith.addf %42, %4 : vector<16x256xf32>
    %cst_33 = arith.constant 0.000000e+00 : f32
    %44 = vector.broadcast %cst_33 : f32 to vector<16x256xf32>
    %45 = arith.maximumf %43, %44 : vector<16x256xf32>
    %46 = arith.truncf %45 : vector<16x256xf32> to vector<16x256xbf16>
    %cst_34 = arith.constant dense<0.000000e+00> : vector<32x256xf32>
    %47 = tpu.matmul %1, %46, %cst_34 {dimension_numbers = #tpu.dot_dimension_numbers<[1], [0], [0], [1], [0, 0, 1, 1], [], []>} : vector<32x16xbf16>, vector<16x256xbf16>, vector<32x256xf32> -> vector<32x256xf32>
    %48 = arith.maximumf %39, %47 : vector<32x256xf32>
    %c0_35 = arith.constant 0 : index
    %c5 = arith.constant 5 : index
    %c0_36 = arith.constant 0 : index
    %c0_37 = arith.constant 0 : index
    %49 = vector.load %arg2[%c0_35, %c5, %c0_36, %c0_37] : memref<1x8x3x256xbf16, #tpu.memory_space<vmem>>, vector<1x1x3x256xbf16>
    %50 = vector.shape_cast %49 : vector<1x1x3x256xbf16> to vector<3x256xbf16>
    %cst_38 = arith.constant dense<0.000000e+00> : vector<16x256xf32>
    %51 = tpu.matmul %0, %50, %cst_38 {dimension_numbers = #tpu.dot_dimension_numbers<[1], [0], [0], [1], [0, 0, 1, 1], [], []>} : vector<16x3xbf16>, vector<3x256xbf16>, vector<16x256xf32> -> vector<16x256xf32>
    %52 = arith.addf %51, %4 : vector<16x256xf32>
    %cst_39 = arith.constant 0.000000e+00 : f32
    %53 = vector.broadcast %cst_39 : f32 to vector<16x256xf32>
    %54 = arith.maximumf %52, %53 : vector<16x256xf32>
    %55 = arith.truncf %54 : vector<16x256xf32> to vector<16x256xbf16>
    %cst_40 = arith.constant dense<0.000000e+00> : vector<32x256xf32>
    %56 = tpu.matmul %1, %55, %cst_40 {dimension_numbers = #tpu.dot_dimension_numbers<[1], [0], [0], [1], [0, 0, 1, 1], [], []>} : vector<32x16xbf16>, vector<16x256xbf16>, vector<32x256xf32> -> vector<32x256xf32>
    %57 = arith.maximumf %48, %56 : vector<32x256xf32>
    %c0_41 = arith.constant 0 : index
    %c6 = arith.constant 6 : index
    %c0_42 = arith.constant 0 : index
    %c0_43 = arith.constant 0 : index
    %58 = vector.load %arg2[%c0_41, %c6, %c0_42, %c0_43] : memref<1x8x3x256xbf16, #tpu.memory_space<vmem>>, vector<1x1x3x256xbf16>
    %59 = vector.shape_cast %58 : vector<1x1x3x256xbf16> to vector<3x256xbf16>
    %cst_44 = arith.constant dense<0.000000e+00> : vector<16x256xf32>
    %60 = tpu.matmul %0, %59, %cst_44 {dimension_numbers = #tpu.dot_dimension_numbers<[1], [0], [0], [1], [0, 0, 1, 1], [], []>} : vector<16x3xbf16>, vector<3x256xbf16>, vector<16x256xf32> -> vector<16x256xf32>
    %61 = arith.addf %60, %4 : vector<16x256xf32>
    %cst_45 = arith.constant 0.000000e+00 : f32
    %62 = vector.broadcast %cst_45 : f32 to vector<16x256xf32>
    %63 = arith.maximumf %61, %62 : vector<16x256xf32>
    %64 = arith.truncf %63 : vector<16x256xf32> to vector<16x256xbf16>
    %cst_46 = arith.constant dense<0.000000e+00> : vector<32x256xf32>
    %65 = tpu.matmul %1, %64, %cst_46 {dimension_numbers = #tpu.dot_dimension_numbers<[1], [0], [0], [1], [0, 0, 1, 1], [], []>} : vector<32x16xbf16>, vector<16x256xbf16>, vector<32x256xf32> -> vector<32x256xf32>
    %66 = arith.maximumf %57, %65 : vector<32x256xf32>
    %c0_47 = arith.constant 0 : index
    %c7 = arith.constant 7 : index
    %c0_48 = arith.constant 0 : index
    %c0_49 = arith.constant 0 : index
    %67 = vector.load %arg2[%c0_47, %c7, %c0_48, %c0_49] : memref<1x8x3x256xbf16, #tpu.memory_space<vmem>>, vector<1x1x3x256xbf16>
    %68 = vector.shape_cast %67 : vector<1x1x3x256xbf16> to vector<3x256xbf16>
    %cst_50 = arith.constant dense<0.000000e+00> : vector<16x256xf32>
    %69 = tpu.matmul %0, %68, %cst_50 {dimension_numbers = #tpu.dot_dimension_numbers<[1], [0], [0], [1], [0, 0, 1, 1], [], []>} : vector<16x3xbf16>, vector<3x256xbf16>, vector<16x256xf32> -> vector<16x256xf32>
    %70 = arith.addf %69, %4 : vector<16x256xf32>
    %cst_51 = arith.constant 0.000000e+00 : f32
    %71 = vector.broadcast %cst_51 : f32 to vector<16x256xf32>
    %72 = arith.maximumf %70, %71 : vector<16x256xf32>
    %73 = arith.truncf %72 : vector<16x256xf32> to vector<16x256xbf16>
    %cst_52 = arith.constant dense<0.000000e+00> : vector<32x256xf32>
    %74 = tpu.matmul %1, %73, %cst_52 {dimension_numbers = #tpu.dot_dimension_numbers<[1], [0], [0], [1], [0, 0, 1, 1], [], []>} : vector<32x16xbf16>, vector<16x256xbf16>, vector<32x256xf32> -> vector<32x256xf32>
    %75 = arith.maximumf %66, %74 : vector<32x256xf32>
    %c0_53 = arith.constant 0 : index
    %c0_54 = arith.constant 0 : index
    %76 = vector.load %arg6[%c0_53, %c0_54] : memref<32x1xf32, #tpu.memory_space<vmem>>, vector<32x1xf32>
    %77 = vector.broadcast %76 : vector<32x1xf32> to vector<32x256xf32>
    %78 = arith.addf %75, %77 : vector<32x256xf32>
    %cst_55 = arith.constant 0.000000e+00 : f32
    %79 = vector.broadcast %cst_55 : f32 to vector<32x256xf32>
    %80 = arith.maximumf %78, %79 : vector<32x256xf32>
    %c0_56 = arith.constant 0 : index
    %c0_57 = arith.constant 0 : index
    %c0_58 = arith.constant 0 : index
    %81 = vector.load %arg7[%c0_56, %c0_57, %c0_58] : memref<1x32x256xf32, #tpu.memory_space<vmem>>, vector<1x32x256xf32>
    %82 = vector.shape_cast %81 : vector<1x32x256xf32> to vector<32x256xf32>
    %83 = vector.shape_cast %80 : vector<32x256xf32> to vector<1x32x256xf32>
    tpu.vector_store %arg7[%c0_56, %c0_57, %c0_58], %83 {strides = array<i32>} : memref<1x32x256xf32, #tpu.memory_space<vmem>>, vector<1x32x256xf32>,
    return
  }
  func.func @transform_0(%arg0: i32, %arg1: i32) -> (i32, i32, i32, i32) {
    %c0_i32 = arith.constant 0 : i32
    %c0_i32_0 = arith.constant 0 : i32
    %c0_i32_1 = arith.constant 0 : i32
    return %arg0, %c0_i32, %c0_i32_0, %arg1 : i32, i32, i32, i32
  }
  func.func @transform_1(%arg0: i32, %arg1: i32) -> (i32, i32) {
    %c0_i32 = arith.constant 0 : i32
    %c0_i32_0 = arith.constant 0 : i32
    %c0_i32_1 = arith.constant 0 : i32
    return %c0_i32, %c0_i32_0 : i32, i32
  }
  func.func @transform_2(%arg0: i32, %arg1: i32) -> (i32, i32) {
    %c0_i32 = arith.constant 0 : i32
    %c0_i32_0 = arith.constant 0 : i32
    %c0_i32_1 = arith.constant 0 : i32
    return %c0_i32, %c0_i32_0 : i32, i32
  }
  func.func @transform_3(%arg0: i32, %arg1: i32) -> (i32, i32) {
    %c0_i32 = arith.constant 0 : i32
    %c0_i32_0 = arith.constant 0 : i32
    %c0_i32_1 = arith.constant 0 : i32
    return %c0_i32, %c0_i32_0 : i32, i32
  }
  func.func @transform_4(%arg0: i32, %arg1: i32) -> (i32, i32) {
    %c0_i32 = arith.constant 0 : i32
    %c0_i32_0 = arith.constant 0 : i32
    %c0_i32_1 = arith.constant 0 : i32
    return %c0_i32, %c0_i32_0 : i32, i32
  }
  func.func @transform_5(%arg0: i32, %arg1: i32) -> (i32, i32, i32) {
    %c0_i32 = arith.constant 0 : i32
    %c0_i32_0 = arith.constant 0 : i32
    return %arg0, %c0_i32, %arg1 : i32, i32, i32
  }
}

</mosaic_0001>

<bundles_post_ra>
// kernel: lse_forward.1
= control target key start
LH: loop header
LB: loop body
LE: loop exit
PB: predicated region body
PF: predicated region fallthrough
CT: control target
= control target key end

     0   :  { %s1327_s18 = smov 0   ;;  %s1329_s19 = smov 0   ;;  %s1783_s0 = inlined_call_operand.vmem [shape: bf16[2,8,3,256], index: 0, kind: input, shape index: {}]   ;;  %s1784_s1 = inlined_call_operand.vmem [shape: bf16[16,3], index: 1, kind: input, shape index: {}]   ;;  %s1785_s2 = inlined_call_operand.vmem [shape: f32[16,1], index: 2, kind: input, shape index: {}]   ;;  %s1786_s3 = inlined_call_operand.vmem [shape: bf16[32,16], index: 3, kind: input, shape index: {}]   ;;  %s1787_s4 = inlined_call_operand.vmem [shape: f32[32,1], index: 4, kind: input, shape index: {}]   ;;  %s1788_s5 = inlined_call_operand.vmem [shape: f32[2,32,256], index: 5, kind: output, shape index: {}]  }
   0x1   :  { %s1331_s20 = smov 0  }
   0x2 LB: > { %s27_s21 = sadd.s32 1, %s1289_s19  ;;  %p1163_p0 = scmp.ge.s32.totalorder %s1293_s20, 1  ;;  %s1293_s20 = sphi %s1331_s20, %s15_s20   ;;  %s1289_s19 = sphi %s1329_s19, %s1790_s19   ;;  %s1285_s18 = sphi %s1327_s18, %s1789_s18  }
   0x3   : > { %p29_p1 = scmp.ge.s32.totalorder %s27_s21, 2  ;;  %p208_p2 = scmp.lt.s32.totalorder %s1293_s20, 3 }
   0x5   : > { %s1792_s21 = smov (%p29_p1, %s27_s21), 0  ;;  %p209_p3 = pnand %p1163_p0, %p208_p2 }
   0x6   : > { %p245_p4 = scmp.lt.s32.totalorder (!%p209_p3), %s1285_s18, 1 }
   0x7   : > { %212 = sbr.rel (%p209_p3) target bundleno = 888 (0x378), region = 40 }
   0xc   : > { %v271_v0 = vld [vmem:[%s1785_s2] sm:$0xff]  ;;  %s1794_s18 = smov (!%p245_p4, %s1285_s18), 1  ;;  %v1295_v1 = vmov 0   ;;  %vm297_vm0 = vcmask 1040384   ;;  %v272_v3 = vld [vmem:[%s1785_s2 + $0x8] sm:$0xff]  ;;  %vm298_vm1 = vcmask 1041408  }
   0xd   : > { %1268 = vset.pattern.permute.xlu0 %v1295_v1  ;;  %1269 = vset.pattern.permute.xlu1 %v1295_v1  ;;  %s1237_s24 = sshll.u32 %s1794_s18, 5  ;;  %v1296_v4 = vmov 65535   ;;  %v1368_v12 = vld [vmem:[%s1784_s1] sm:$0xff]  ;;  %vm293_vm2 = vcmask 23552   ;;  %vm349_vm3 = vcmask 130048   ;;  %v1415_v59 = vld [vmem:[%s1786_s3 + $0x8] sm:$0xff] }
   0xe   : > { %275 = vperm.xlu0 %1268, %v271_v0   ;;  %1270 = vset.pattern.permute.xlu2 %v1295_v1  ;;  %s1354_s27 = scalar_lea.vmem %s1783_s0, %s1237_s24  ;;  %v299_v5 = vsel %vm297_vm0, 4294967295, %v1296_v4  ;;  %v1400_v54 = vld [vmem:[%s1786_s3] sm:$0xff]  ;;  %s1238_s23 = sshll.u32 %s1794_s18, 6 }
   0xf   : > { %v283_v2 = vld [vmem:[%s1354_s27] sm:$0xf]  ;;  %v1360_v6 = vsel %vm298_vm1, %v299_v5, 0  ;;  %v1186_v7 = vld [vmem:[%s1354_s27 + $0x4] sm:$0xf]  ;;  %s1746_s26 = scalar_lea.vmem %s1788_s5, %s1238_s23 }
  0x10   : > { %290 = vst [vmem:[#allocation1] ss:$4 sm:$0xff] %v283_v2  ;;  %v1193_v13 = vld [vmem:[%s1354_s27 + $0x8] sm:$0xf]  ;;  %v1200_v20 = vld [vmem:[%s1354_s27 + $0xc] sm:$0xf] }
  0x11   : > { %v1207_v28 = vld [vmem:[%s1354_s27 + $0x10] sm:$0xf] }
  0x16   : > { %280 = vperm.xlu0 %1268, %v272_v3  }
  0x17   : > { %v291_v8 = vld.sshfl [vmem:[#allocation1] sm:$0xff pattern:$0x73625140]  ;;  %v292_v9 = vld.sshfl [vmem:[#allocation1 + $0x8] sm:$0xff pattern:$0x73625140] }
  0x18   : > { %v301_v10 = vand.u32 %v1360_v6, %v291_v8  ;;  %v303_v11 = vand.u32 %v1360_v6, %v292_v9  ;;  %397 = vst [vmem:[#allocation1] ss:$4 sm:$0xff] %v1186_v7 }
  0x1a   : > { %312 = vmatpush.bf16.msra.mxu2 %v301_v10  ;;  %326 = vmatpush.bf16.msra.mxu3 %v303_v11 }
  0x1d   : > { %1172 = vmatmul.msk.bf16.vlgmr.msra.gmra.mxu2 %vm293_vm2, %v1368_v12  ;;  %1173 = vmatmul.msk.bf16.vlgmr.msra.gmra.mxu3 %vm293_vm2, %v1368_v12 }
  0x1f   : > { %v398_v14 = vld.sshfl [vmem:[#allocation1] sm:$0xff pattern:$0x73625140]  ;;  %v399_v15 = vld.sshfl [vmem:[#allocation1 + $0x8] sm:$0xff pattern:$0x73625140] }
  0x20   : > { %v400_v16 = vand.u32 %v398_v14, %v1360_v6  ;;  %v402_v17 = vand.u32 %v399_v15, %v1360_v6  ;;  %487 = vst [vmem:[#allocation1] ss:$4 sm:$0xff] %v1193_v13 }
  0x22   : > { %411 = vmatpush.bf16.msra.mxu0 %v400_v16  ;;  %425 = vmatpush.bf16.msra.mxu1 %v402_v17 }
  0x25   : > { %1187 = vmatmul.msk.bf16.vlgmr.msra.gmra.mxu0 %vm293_vm2, %v1368_v12  ;;  %1188 = vmatmul.msk.bf16.vlgmr.msra.gmra.mxu1 %vm293_vm2, %v1368_v12 }
  0x27   : > { %v488_v18 = vld.sshfl [vmem:[#allocation1] sm:$0xff pattern:$0x73625140]  ;;  %v489_v19 = vld.sshfl [vmem:[#allocation1 + $0x8] sm:$0xff pattern:$0x73625140] }
  0x28   : > { %577 = vst [vmem:[#allocation1] ss:$4 sm:$0xff] %v1200_v20  ;;  %v490_v48 = vand.u32 %v488_v18, %v1360_v6  ;;  %v492_v49 = vand.u32 %v489_v19, %v1360_v6 }
  0x2f   : > { %v578_v26 = vld.sshfl [vmem:[#allocation1] sm:$0xff pattern:$0x73625140]  ;;  %v579_v27 = vld.sshfl [vmem:[#allocation1 + $0x8] sm:$0xff pattern:$0x73625140] }
  0x30   : > { %667 = vst [vmem:[#allocation1] ss:$4 sm:$0xff] %v1207_v28  ;;  %v580_v55 = vand.u32 %v578_v26, %v1360_v6  ;;  %v582_v58 = vand.u32 %v579_v27, %v1360_v6 }
  0x37   : > { %v669_v26 = vld.sshfl [vmem:[#allocation1 + $0x8] sm:$0xff pattern:$0x73625140] }
  0x80   : > { %v1382_v21 = vpop.permute.xlu0 %275 }
  0x88   : > { %v1387_v31 = vpop.permute.xlu0 %280 }
  0xa0   : > { %v314_v22 = vpop.f32.mrf.mxu2  ;;  %v328_v23 = vpop.f32.mrf.mxu3 }
  0xa1   : > { %v315_v29 = vadd.f32 %v314_v22, %v1382_v21  ;;  %v329_v30 = vadd.f32 %v328_v23, %v1382_v21 }
  0xa2   : > { %v413_v24 = vpop.f32.mrf.mxu0  ;;  %v427_v25 = vpop.f32.mrf.mxu1 }
  0xa3   : > { %v414_v32 = vadd.f32 %v413_v24, %v1382_v21  ;;  %v428_v33 = vadd.f32 %v427_v25, %v1382_v21  ;;  %v333_v38 = vmax.f32 %v315_v29, 0.0  ;;  %v334_v39 = vmax.f32 %v329_v30, 0.0  ;;  %v668_v25 = vld.sshfl [vmem:[#allocation1] sm:$0xff pattern:$0x73625140] }
  0xa4   : > { %v1214_v29 = vld [vmem:[%s1354_s27 + $0x14] sm:$0xf] }
  0xa5   : > { %v432_v46 = vmax.f32 %v414_v32, 0.0  ;;  %v433_v47 = vmax.f32 %v428_v33, 0.0  ;;  %757 = vst [vmem:[#allocation1] ss:$4 sm:$0xff] %v1214_v29 }
  0xa8   : > { %v316_v34 = vpop.f32.mrf.mxu2  ;;  %v330_v35 = vpop.f32.mrf.mxu3 }
  0xa9   : > { %v317_v36 = vadd.f32 %v316_v34, %v1387_v31  ;;  %v331_v37 = vadd.f32 %v330_v35, %v1387_v31 }
  0xaa   : > { %v415_v40 = vpop.f32.mrf.mxu0  ;;  %v429_v41 = vpop.f32.mrf.mxu1 }
  0xab   : > { %v335_v42 = vmax.f32 %v317_v36, 0.0  ;;  %v336_v43 = vmax.f32 %v331_v37, 0.0  ;;  %v416_v44 = vadd.f32 %v415_v40, %v1387_v31  ;;  %v430_v45 = vadd.f32 %v429_v41, %v1387_v31  ;;  %v1221_v37 = vld [vmem:[%s1354_s27 + $0x18] sm:$0xf] }
  0xad   : > { %v434_v50 = vmax.f32 %v416_v44, 0.0  ;;  %v435_v51 = vmax.f32 %v430_v45, 0.0  ;;  %v337_v52 = vpack.c.bf16 %v335_v42, %v333_v38  ;;  %v338_v53 = vpack.c.bf16 %v336_v43, %v334_v39 }
  0xaf   : > { %363 = vmatpush.bf16.msrb.mxu2 %v337_v52  ;;  %382 = vmatpush.bf16.msrb.mxu3 %v338_v53  ;;  %v436_v56 = vpack.c.bf16 %v434_v50, %v432_v46  ;;  %v437_v57 = vpack.c.bf16 %v435_v51, %v433_v47  ;;  %v758_v46 = vld.sshfl [vmem:[#allocation1] sm:$0xff pattern:$0x73625140]  ;;  %v759_v47 = vld.sshfl [vmem:[#allocation1 + $0x8] sm:$0xff pattern:$0x73625140] }
  0xb0   : > { %847 = vst [vmem:[#allocation1] ss:$4 sm:$0xff] %v1221_v37  ;;  %v760_v52 = vand.u32 %v758_v46, %v1360_v6  ;;  %v762_v53 = vand.u32 %v759_v47, %v1360_v6 }
  0xb1   : > { %445 = vmatpush.bf16.msrb.mxu0 %v436_v56  ;;  %464 = vmatpush.bf16.msrb.mxu1 %v437_v57 }
  0xb2   : > { %1182 = vmatmul.msk.bf16.vlgmr.msrb.gmra.mxu2 %vm349_vm3, %v1400_v54  ;;  %1184 = vmatmul.msk.bf16.vlgmr.msrb.gmra.mxu3 %vm349_vm3, %v1400_v54 }
  0xb3   : > { %501 = vmatpush.bf16.msra.mxu2 %v490_v48  ;;  %515 = vmatpush.bf16.msra.mxu3 %v492_v49 }
  0xb4   : > { %1189 = vmatmul.msk.bf16.vlgmr.msrb.gmra.mxu0 %vm349_vm3, %v1400_v54  ;;  %1191 = vmatmul.msk.bf16.vlgmr.msrb.gmra.mxu1 %vm349_vm3, %v1400_v54 }
  0xb5   : > { %591 = vmatpush.bf16.msra.mxu0 %v580_v55  ;;  %605 = vmatpush.bf16.msra.mxu1 %v582_v58 }
  0xb7   : > { %v848_v47 = vld.sshfl [vmem:[#allocation1] sm:$0xff pattern:$0x73625140] }
  0xc2   : > { %1183 = vmatmul.msk.bf16.gmra.mxu2 %vm349_vm3, %v1415_v59  ;;  %1185 = vmatmul.msk.bf16.gmra.mxu3 %vm349_vm3, %v1415_v59 }
  0xc4   : > { %1190 = vmatmul.msk.bf16.gmra.mxu0 %vm349_vm3, %v1415_v59  ;;  %1192 = vmatmul.msk.bf16.gmra.mxu1 %vm349_vm3, %v1415_v59 }
  0xd2   : > { %1194 = vmatmul.msk.bf16.vlgmr.msra.gmra.mxu2 %vm293_vm2, %v1368_v12  ;;  %1195 = vmatmul.msk.bf16.vlgmr.msra.gmra.mxu3 %vm293_vm2, %v1368_v12 }
  0xd4   : > { %1201 = vmatmul.msk.bf16.vlgmr.msra.gmra.mxu0 %vm293_vm2, %v1368_v12  ;;  %1202 = vmatmul.msk.bf16.vlgmr.msra.gmra.mxu1 %vm293_vm2, %v1368_v12 }
 0x131   : > { %v1433_v60 = vpop.f32.mrf.mxu0  ;;  %v1435_v61 = vpop.f32.mrf.mxu1 }
 0x135   : > { %v1437_v62 = vpop.f32.mrf.mxu2  ;;  %v1439_v63 = vpop.f32.mrf.mxu3 }
 0x136   : > { %v476_v0 = vmax.f32 %v1437_v62, %v1433_v60  ;;  %v477_v1 = vmax.f32 %v1439_v63, %v1435_v61 }
 0x139   : > { %v1445_v2 = vpop.f32.mrf.mxu0  ;;  %v1447_v3 = vpop.f32.mrf.mxu1 }
 0x13d   : > { %v1449_v4 = vpop.f32.mrf.mxu2  ;;  %v1451_v5 = vpop.f32.mrf.mxu3 }
 0x13e   : > { %v478_v7 = vmax.f32 %v1449_v4, %v1445_v2  ;;  %v479_v8 = vmax.f32 %v1451_v5, %v1447_v3 }
 0x141   : > { %v1457_v9 = vpop.f32.mrf.mxu0  ;;  %v1459_v10 = vpop.f32.mrf.mxu1 }
 0x145   : > { %v1461_v11 = vpop.f32.mrf.mxu2  ;;  %v1463_v13 = vpop.f32.mrf.mxu3 }
 0x146   : > { %v480_v14 = vmax.f32 %v1461_v11, %v1457_v9  ;;  %v481_v15 = vmax.f32 %v1463_v13, %v1459_v10  ;;  %v849_v9 = vld.sshfl [vmem:[#allocation1 + $0x8] sm:$0xff pattern:$0x73625140] }
 0x149   : > { %v1469_v16 = vpop.f32.mrf.mxu0  ;;  %v1471_v17 = vpop.f32.mrf.mxu1 }
 0x14d   : > { %v1473_v18 = vpop.f32.mrf.mxu2  ;;  %v1475_v19 = vpop.f32.mrf.mxu3 }
 0x14e   : > { %v482_v20 = vmax.f32 %v1473_v18, %v1469_v16  ;;  %v483_v22 = vmax.f32 %v1475_v19, %v1471_v17 }
 0x151   : > { %v593_v23 = vpop.f32.mrf.mxu0  ;;  %v607_v24 = vpop.f32.mrf.mxu1 }
 0x152   : > { %v594_v30 = vadd.f32 %v593_v23, %v1382_v21  ;;  %v608_v32 = vadd.f32 %v607_v24, %v1382_v21  ;;  %v670_v23 = vand.u32 %v668_v25, %v1360_v6  ;;  %v672_v24 = vand.u32 %v669_v26, %v1360_v6 }
 0x154   : > { %v612_v38 = vmax.f32 %v594_v30, 0.0  ;;  %v613_v39 = vmax.f32 %v608_v32, 0.0 }
 0x155   : > { %v503_v27 = vpop.f32.mrf.mxu2  ;;  %v517_v28 = vpop.f32.mrf.mxu3 }
 0x156   : > { %v504_v40 = vadd.f32 %v503_v27, %v1382_v21  ;;  %v518_v41 = vadd.f32 %v517_v28, %v1382_v21 }
 0x158   : > { %v522_v55 = vmax.f32 %v504_v40, 0.0  ;;  %v523_v56 = vmax.f32 %v518_v41, 0.0 }
 0x159   : > { %v595_v33 = vpop.f32.mrf.mxu0  ;;  %v609_v34 = vpop.f32.mrf.mxu1 }
 0x15a   : > { %v596_v35 = vadd.f32 %v595_v33, %v1387_v31  ;;  %v610_v36 = vadd.f32 %v609_v34, %v1387_v31 }
 0x15c   : > { %v614_v42 = vmax.f32 %v596_v35, 0.0  ;;  %v615_v43 = vmax.f32 %v610_v36, 0.0 }
 0x15d   : > { %v505_v44 = vpop.f32.mrf.mxu2  ;;  %v519_v45 = vpop.f32.mrf.mxu3 }
 0x15e   : > { %v616_v48 = vpack.c.bf16 %v614_v42, %v612_v38  ;;  %v617_v49 = vpack.c.bf16 %v615_v43, %v613_v39  ;;  %v506_v50 = vadd.f32 %v505_v44, %v1387_v31  ;;  %v520_v51 = vadd.f32 %v519_v45, %v1387_v31 }
 0x160   : > { %v524_v57 = vmax.f32 %v506_v50, 0.0  ;;  %v525_v58 = vmax.f32 %v520_v51, 0.0  ;;  %625 = vmatpush.bf16.msrb.mxu0 %v616_v48  ;;  %644 = vmatpush.bf16.msrb.mxu1 %v617_v49 }
 0x162   : > { %v526_v27 = vpack.c.bf16 %v524_v57, %v522_v55  ;;  %v527_v28 = vpack.c.bf16 %v525_v58, %v523_v56 }
 0x163   : > { %1203 = vmatmul.msk.bf16.vlgmr.msrb.gmra.mxu0 %vm349_vm3, %v1400_v54  ;;  %1205 = vmatmul.msk.bf16.vlgmr.msrb.gmra.mxu1 %vm349_vm3, %v1400_v54 }
 0x164   : > { %771 = vmatpush.bf16.msra.mxu0 %v760_v52  ;;  %785 = vmatpush.bf16.msra.mxu1 %v762_v53 }
 0x165   : > { %535 = vmatpush.bf16.msrb.mxu2 %v526_v27  ;;  %554 = vmatpush.bf16.msrb.mxu3 %v527_v28 }
 0x168   : > { %1196 = vmatmul.msk.bf16.vlgmr.msrb.gmra.mxu2 %vm349_vm3, %v1400_v54  ;;  %1198 = vmatmul.msk.bf16.vlgmr.msrb.gmra.mxu3 %vm349_vm3, %v1400_v54 }
 0x169   : > { %681 = vmatpush.bf16.msra.mxu2 %v670_v23  ;;  %695 = vmatpush.bf16.msra.mxu3 %v672_v24 }
 0x173   : > { %1204 = vmatmul.msk.bf16.gmra.mxu0 %vm349_vm3, %v1415_v59  ;;  %1206 = vmatmul.msk.bf16.gmra.mxu1 %vm349_vm3, %v1415_v59 }
 0x178   : > { %1197 = vmatmul.msk.bf16.gmra.mxu2 %vm349_vm3, %v1415_v59  ;;  %1199 = vmatmul.msk.bf16.gmra.mxu3 %vm349_vm3, %v1415_v59 }
 0x183   : > { %1215 = vmatmul.msk.bf16.vlgmr.msra.gmra.mxu0 %vm293_vm2, %v1368_v12  ;;  %1216 = vmatmul.msk.bf16.vlgmr.msra.gmra.mxu1 %vm293_vm2, %v1368_v12 }
 0x188   : > { %1208 = vmatmul.msk.bf16.vlgmr.msra.gmra.mxu2 %vm293_vm2, %v1368_v12  ;;  %1209 = vmatmul.msk.bf16.vlgmr.msra.gmra.mxu3 %vm293_vm2, %v1368_v12 }
 0x1e0   : > { %v1519_v25 = vpop.f32.mrf.mxu0  ;;  %v1521_v26 = vpop.f32.mrf.mxu1 }
 0x1e8   : > { %v1523_v29 = vpop.f32.mrf.mxu0  ;;  %v1525_v30 = vpop.f32.mrf.mxu1 }
 0x1eb   : > { %v537_v32 = vpop.f32.mrf.mxu2  ;;  %v556_v33 = vpop.f32.mrf.mxu3 }
 0x1ec   : > { %v1530_v34 = vmax.f32 %v476_v0, %v537_v32  ;;  %v1535_v35 = vmax.f32 %v477_v1, %v556_v33 }
 0x1ee   : > { %v656_v36 = vmax.f32 %v1530_v34, %v1519_v25  ;;  %v657_v37 = vmax.f32 %v1535_v35, %v1521_v26 }
 0x1f0   : > { %v1541_v38 = vpop.f32.mrf.mxu0  ;;  %v1543_v39 = vpop.f32.mrf.mxu1 }
 0x1f3   : > { %v539_v40 = vpop.f32.mrf.mxu2  ;;  %v558_v60 = vpop.f32.mrf.mxu3 }
 0x1f4   : > { %v1548_v62 = vmax.f32 %v478_v7, %v539_v40  ;;  %v1553_v61 = vmax.f32 %v479_v8, %v558_v60  ;;  %v1228_v7 = vld [vmem:[%s1354_s27 + $0x1c] sm:$0xf] }
 0x1f5   : > { %937 = vst [vmem:[#allocation1] ss:$4 sm:$0xff] %v1228_v7 }
 0x1f6   : > { %v658_v63 = vmax.f32 %v1548_v62, %v1523_v29  ;;  %v659_v0 = vmax.f32 %v1553_v61, %v1525_v30 }
 0x1f8   : > { %v1559_v1 = vpop.f32.mrf.mxu0  ;;  %v1561_v41 = vpop.f32.mrf.mxu1 }
 0x1fb   : > { %v542_v42 = vpop.f32.mrf.mxu2  ;;  %v561_v43 = vpop.f32.mrf.mxu3 }
 0x1fc   : > { %v1566_v2 = vmax.f32 %v480_v14, %v542_v42  ;;  %v1571_v3 = vmax.f32 %v481_v15, %v561_v43  ;;  %v938_v53 = vld.sshfl [vmem:[#allocation1] sm:$0xff pattern:$0x73625140]  ;;  %v939_v55 = vld.sshfl [vmem:[#allocation1 + $0x8] sm:$0xff pattern:$0x73625140] }
 0x1fd   : > { %v940_v58 = vand.u32 %v938_v53, %v1360_v6  ;;  %v942_v23 = vand.u32 %v939_v55, %v1360_v6 }
 0x1fe   : > { %v660_v4 = vmax.f32 %v1566_v2, %v1541_v38  ;;  %v661_v5 = vmax.f32 %v1571_v3, %v1543_v39 }
 0x200   : > { %v773_v8 = vpop.f32.mrf.mxu0  ;;  %v787_v44 = vpop.f32.mrf.mxu1 }
 0x201   : > { %v774_v15 = vadd.f32 %v773_v8, %v1382_v21  ;;  %v788_v48 = vadd.f32 %v787_v44, %v1382_v21  ;;  %v850_v8 = vand.u32 %v848_v47, %v1360_v6  ;;  %v852_v44 = vand.u32 %v849_v9, %v1360_v6 }
 0x203   : > { %v544_v45 = vpop.f32.mrf.mxu2  ;;  %v563_v46 = vpop.f32.mrf.mxu3  ;;  %v793_v50 = vmax.f32 %v788_v48, 0.0 }
 0x204   : > { %v1581_v11 = vmax.f32 %v482_v20, %v544_v45  ;;  %v1586_v10 = vmax.f32 %v483_v22, %v563_v46  ;;  %v792_v22 = vmax.f32 %v774_v15, 0.0 }
 0x206   : > { %v662_v13 = vmax.f32 %v1581_v11, %v1559_v1  ;;  %v663_v14 = vmax.f32 %v1586_v10, %v1561_v41 }
 0x208   : > { %v775_v49 = vpop.f32.mrf.mxu0  ;;  %v789_v16 = vpop.f32.mrf.mxu1 }
 0x209   : > { %v776_v18 = vadd.f32 %v775_v49, %v1387_v31  ;;  %v790_v20 = vadd.f32 %v789_v16, %v1387_v31 }
 0x20b   : > { %v683_v17 = vpop.f32.mrf.mxu2  ;;  %v697_v19 = vpop.f32.mrf.mxu3  ;;  %v794_v51 = vmax.f32 %v776_v18, 0.0  ;;  %v795_v52 = vmax.f32 %v790_v20, 0.0 }
 0x20c   : > { %v684_v24 = vadd.f32 %v683_v17, %v1382_v21  ;;  %v698_v27 = vadd.f32 %v697_v19, %v1382_v21 }
 0x20d   : > { %v796_v56 = vpack.c.bf16 %v794_v51, %v792_v22  ;;  %v797_v57 = vpack.c.bf16 %v795_v52, %v793_v50 }
 0x20e   : > { %v702_v60 = vmax.f32 %v684_v24, 0.0  ;;  %v703_v42 = vmax.f32 %v698_v27, 0.0 }
 0x20f   : > { %805 = vmatpush.bf16.msrb.mxu0 %v796_v56  ;;  %824 = vmatpush.bf16.msrb.mxu1 %v797_v57 }
 0x212   : > { %1217 = vmatmul.msk.bf16.vlgmr.msrb.gmra.mxu0 %vm349_vm3, %v1400_v54  ;;  %1219 = vmatmul.msk.bf16.vlgmr.msrb.gmra.mxu1 %vm349_vm3, %v1400_v54 }
 0x213   : > { %951 = vmatpush.bf16.msra.mxu0 %v940_v58  ;;  %965 = vmatpush.bf16.msra.mxu1 %v942_v23  ;;  %v685_v28 = vpop.f32.mrf.mxu2  ;;  %v699_v32 = vpop.f32.mrf.mxu3 }
 0x214   : > { %v686_v33 = vadd.f32 %v685_v28, %v1387_v31  ;;  %v700_v40 = vadd.f32 %v699_v32, %v1387_v31  ;;  %v1024_v28 = vld [vmem:[%s1787_s4] sm:$0xff]  ;;  %v1026_v32 = vld [vmem:[%s1787_s4 + $0x10] sm:$0xff] }
 0x215   : > { %1030 = vperm.xlu1 %1269, %v1024_v28   ;;  %1040 = vperm.xlu2 %1270, %v1026_v32  }
 0x216   : > { %v704_v43 = vmax.f32 %v686_v33, 0.0  ;;  %v705_v7 = vmax.f32 %v700_v40, 0.0 }
 0x218   : > { %v706_v45 = vpack.c.bf16 %v704_v43, %v702_v60  ;;  %v707_v46 = vpack.c.bf16 %v705_v7, %v703_v42 }
 0x21a   : > { %715 = vmatpush.bf16.msrb.mxu2 %v706_v45  ;;  %734 = vmatpush.bf16.msrb.mxu3 %v707_v46 }
 0x21d   : > { %1210 = vmatmul.msk.bf16.vlgmr.msrb.gmra.mxu2 %vm349_vm3, %v1400_v54  ;;  %1212 = vmatmul.msk.bf16.vlgmr.msrb.gmra.mxu3 %vm349_vm3, %v1400_v54 }
 0x21e   : > { %861 = vmatpush.bf16.msra.mxu2 %v850_v8  ;;  %875 = vmatpush.bf16.msra.mxu3 %v852_v44  ;;  %v1025_v8 = vld [vmem:[%s1787_s4 + $0x8] sm:$0xff]  ;;  %v1027_v44 = vld [vmem:[%s1787_s4 + $0x18] sm:$0xff] }
 0x21f   : > { %1035 = vperm.xlu1 %1269, %v1025_v8   ;;  %1045 = vperm.xlu2 %1270, %v1027_v44  }
 0x222   : > { %1218 = vmatmul.msk.bf16.gmra.mxu0 %vm349_vm3, %v1415_v59  ;;  %1220 = vmatmul.msk.bf16.gmra.mxu1 %vm349_vm3, %v1415_v59 }
 0x22d   : > { %1211 = vmatmul.msk.bf16.gmra.mxu2 %vm349_vm3, %v1415_v59  ;;  %1213 = vmatmul.msk.bf16.gmra.mxu3 %vm349_vm3, %v1415_v59 }
 0x232   : > { %1229 = vmatmul.msk.bf16.vlgmr.msra.gmra.mxu0 %vm293_vm2, %v1368_v12  ;;  %1230 = vmatmul.msk.bf16.vlgmr.msra.gmra.mxu1 %vm293_vm2, %v1368_v12 }
 0x23d   : > { %1222 = vmatmul.msk.bf16.vlgmr.msra.gmra.mxu2 %vm293_vm2, %v1368_v12  ;;  %1223 = vmatmul.msk.bf16.vlgmr.msra.gmra.mxu3 %vm293_vm2, %v1368_v12 }
 0x28f   : > { %v1628_v6 = vpop.f32.mrf.mxu0  ;;  %v1630_v47 = vpop.f32.mrf.mxu1 }
 0x297   : > { %v1632_v9 = vpop.f32.mrf.mxu0  ;;  %v1634_v15 = vpop.f32.mrf.mxu1 }
 0x29f   : > { %v1646_v12 = vpop.f32.mrf.mxu0  ;;  %v1648_v20 = vpop.f32.mrf.mxu1 }
 0x2a0   : > { %v717_v48 = vpop.f32.mrf.mxu2  ;;  %v736_v49 = vpop.f32.mrf.mxu3 }
 0x2a1   : > { %v1639_v16 = vmax.f32 %v656_v36, %v717_v48  ;;  %v1644_v18 = vmax.f32 %v657_v37, %v736_v49 }
 0x2a3   : > { %v836_v17 = vmax.f32 %v1639_v16, %v1628_v6  ;;  %v837_v19 = vmax.f32 %v1644_v18, %v1630_v47 }
 0x2a7   : > { %v1664_v34 = vpop.f32.mrf.mxu0  ;;  %v1666_v35 = vpop.f32.mrf.mxu1 }
 0x2a8   : > { %v719_v22 = vpop.f32.mrf.mxu2  ;;  %v738_v50 = vpop.f32.mrf.mxu3 }
 0x2a9   : > { %v1657_v25 = vmax.f32 %v658_v63, %v719_v22  ;;  %v1662_v26 = vmax.f32 %v659_v0, %v738_v50 }
 0x2ab   : > { %v838_v36 = vmax.f32 %v1657_v25, %v1632_v9  ;;  %v839_v37 = vmax.f32 %v1662_v26, %v1634_v15  ;;  %v1041_v25 = vpop.permute.xlu2 %1040 }
 0x2af   : > { %v953_v62 = vpop.f32.mrf.mxu0  ;;  %v967_v61 = vpop.f32.mrf.mxu1 }
 0x2b0   : > { %v722_v51 = vpop.f32.mrf.mxu2  ;;  %v741_v52 = vpop.f32.mrf.mxu3  ;;  %v954_v53 = vadd.f32 %v953_v62, %v1382_v21  ;;  %v968_v55 = vadd.f32 %v967_v61, %v1382_v21 }
 0x2b1   : > { %v1675_v29 = vmax.f32 %v660_v4, %v722_v51  ;;  %v1680_v30 = vmax.f32 %v661_v5, %v741_v52  ;;  %v1031_v51 = vpop.permute.xlu1 %1030 }
 0x2b2   : > { %v972_v1 = vmax.f32 %v954_v53, 0.0  ;;  %v973_v11 = vmax.f32 %v968_v55, 0.0 }
 0x2b3   : > { %v840_v63 = vmax.f32 %v1675_v29, %v1646_v12  ;;  %v841_v0 = vmax.f32 %v1680_v30, %v1648_v20 }
 0x2b7   : > { %v955_v4 = vpop.f32.mrf.mxu0  ;;  %v969_v5 = vpop.f32.mrf.mxu1 }
 0x2b8   : > { %v724_v38 = vpop.f32.mrf.mxu2  ;;  %v743_v2 = vpop.f32.mrf.mxu3  ;;  %v956_v56 = vadd.f32 %v955_v4, %v1387_v31  ;;  %v970_v57 = vadd.f32 %v969_v5, %v1387_v31 }
 0x2b9   : > { %v1691_v39 = vmax.f32 %v662_v13, %v724_v38  ;;  %v1696_v3 = vmax.f32 %v663_v14, %v743_v2 }
 0x2ba   : > { %v974_v13 = vmax.f32 %v956_v56, 0.0  ;;  %v975_v24 = vmax.f32 %v970_v57, 0.0 }
 0x2bb   : > { %v842_v58 = vmax.f32 %v1691_v39, %v1664_v34  ;;  %v843_v23 = vmax.f32 %v1696_v3, %v1666_v35 }
 0x2bc   : > { %v976_v27 = vpack.c.bf16 %v974_v13, %v972_v1  ;;  %v977_v41 = vpack.c.bf16 %v975_v24, %v973_v11 }
 0x2be   : > { %985 = vmatpush.bf16.msrb.mxu0 %v976_v27  ;;  %1004 = vmatpush.bf16.msrb.mxu1 %v977_v41 }
 0x2c0   : > { %v863_v10 = vpop.f32.mrf.mxu2  ;;  %v877_v14 = vpop.f32.mrf.mxu3 }
 0x2c1   : > { %1231 = vmatmul.msk.bf16.vlgmr.msrb.gmra.mxu0 %vm349_vm3, %v1400_v54  ;;  %1233 = vmatmul.msk.bf16.vlgmr.msrb.gmra.mxu1 %vm349_vm3, %v1400_v54  ;;  %v864_v33 = vadd.f32 %v863_v10, %v1382_v21  ;;  %v878_v40 = vadd.f32 %v877_v14, %v1382_v21 }
 0x2c3   : > { %v882_v45 = vmax.f32 %v864_v33, 0.0  ;;  %v883_v46 = vmax.f32 %v878_v40, 0.0 }
 0x2c8   : > { %v865_v60 = vpop.f32.mrf.mxu2  ;;  %v879_v42 = vpop.f32.mrf.mxu3 }
 0x2c9   : > { %v866_v43 = vadd.f32 %v865_v60, %v1387_v31  ;;  %v880_v7 = vadd.f32 %v879_v42, %v1387_v31  ;;  %v1046_v42 = vpop.permute.xlu2 %1045 }
 0x2cb   : > { %v884_v48 = vmax.f32 %v866_v43, 0.0  ;;  %v885_v49 = vmax.f32 %v880_v7, 0.0 }
 0x2cd   : > { %v886_v21 = vpack.c.bf16 %v884_v48, %v882_v45  ;;  %v887_v22 = vpack.c.bf16 %v885_v49, %v883_v46 }
 0x2cf   : > { %895 = vmatpush.bf16.msrb.mxu2 %v886_v21  ;;  %914 = vmatpush.bf16.msrb.mxu3 %v887_v22 }
 0x2d1   : > { %1232 = vmatmul.msk.bf16.gmra.mxu0 %vm349_vm3, %v1415_v59  ;;  %1234 = vmatmul.msk.bf16.gmra.mxu1 %vm349_vm3, %v1415_v59 }
 0x2d2   : > { %1224 = vmatmul.msk.bf16.vlgmr.msrb.gmra.mxu2 %vm349_vm3, %v1400_v54  ;;  %1226 = vmatmul.msk.bf16.vlgmr.msrb.gmra.mxu3 %vm349_vm3, %v1400_v54 }
 0x2e2   : > { %1225 = vmatmul.msk.bf16.gmra.mxu2 %vm349_vm3, %v1415_v59  ;;  %1227 = vmatmul.msk.bf16.gmra.mxu3 %vm349_vm3, %v1415_v59 }
 0x33e   : > { %v987_v31 = vpop.f32.mrf.mxu0  ;;  %v1006_v50 = vpop.f32.mrf.mxu1 }
 0x346   : > { %v989_v4 = vpop.f32.mrf.mxu0  ;;  %v1008_v59 = vpop.f32.mrf.mxu1 }
 0x34e   : > { %v992_v27 = vpop.f32.mrf.mxu0  ;;  %v1011_v41 = vpop.f32.mrf.mxu1 }
 0x355   : > { %v897_v52 = vpop.f32.mrf.mxu2  ;;  %v916_v62 = vpop.f32.mrf.mxu3 }
 0x356   : > { %v926_v54 = vmax.f32 %v836_v17, %v897_v52  ;;  %v927_v61 = vmax.f32 %v837_v19, %v916_v62  ;;  %v1036_v19 = vpop.permute.xlu1 %1035  ;;  %v994_v29 = vpop.f32.mrf.mxu0 }
 0x357   : > { %v1013_v30 = vpop.f32.mrf.mxu1 }
 0x358   : > { %v1016_v53 = vmax.f32 %v926_v54, %v987_v31  ;;  %v1017_v55 = vmax.f32 %v927_v61, %v1006_v50 }
 0x35a   : > { %v1048_v38 = vadd.f32 %v1031_v51, %v1016_v53  ;;  %v1049_v2 = vadd.f32 %v1031_v51, %v1017_v55 }
 0x35c   : > { %v1056_v6 = vmax.f32 %v1048_v38, 0.0  ;;  %v1057_v16 = vmax.f32 %v1049_v2, 0.0 }
 0x35d   : > { %v899_v17 = vpop.f32.mrf.mxu2  ;;  %v918_v5 = vpop.f32.mrf.mxu3 }
 0x35e   : > { %1064 = vst [vmem:[%s1746_s26] sm:$0xff] %v1056_v6  ;;  %v928_v47 = vmax.f32 %v838_v36, %v899_v17  ;;  %v929_v18 = vmax.f32 %v839_v37, %v918_v5 }
 0x35f   : > { %1065 = vst [vmem:[%s1746_s26 + $0x8] sm:$0xff] %v1057_v16 }
 0x360   : > { %v1018_v56 = vmax.f32 %v928_v47, %v989_v4  ;;  %v1019_v57 = vmax.f32 %v929_v18, %v1008_v59 }
 0x362   : > { %v1050_v1 = vadd.f32 %v1036_v19, %v1018_v56  ;;  %v1051_v11 = vadd.f32 %v1036_v19, %v1019_v57 }
 0x364   : > { %v1058_v13 = vmax.f32 %v1050_v1, 0.0  ;;  %v1059_v24 = vmax.f32 %v1051_v11, 0.0 }
 0x365   : > { %v902_v10 = vpop.f32.mrf.mxu2  ;;  %v921_v14 = vpop.f32.mrf.mxu3 }
 0x366   : > { %1066 = vst [vmem:[%s1746_s26 + $0x10] sm:$0xff] %v1058_v13  ;;  %v930_v9 = vmax.f32 %v840_v63, %v902_v10  ;;  %v931_v15 = vmax.f32 %v841_v0, %v921_v14 }
 0x367   : > { %1067 = vst [vmem:[%s1746_s26 + $0x18] sm:$0xff] %v1059_v24 }
 0x368   : > { %v1020_v26 = vmax.f32 %v930_v9, %v992_v27  ;;  %v1021_v36 = vmax.f32 %v931_v15, %v1011_v41 }
 0x36a   : > { %v1052_v37 = vadd.f32 %v1041_v25, %v1020_v26  ;;  %v1053_v28 = vadd.f32 %v1041_v25, %v1021_v36 }
 0x36c   : > { %v1060_v32 = vmax.f32 %v1052_v37, 0.0  ;;  %v1061_v33 = vmax.f32 %v1053_v28, 0.0 }
 0x36d   : > { %v904_v40 = vpop.f32.mrf.mxu2  ;;  %v923_v60 = vpop.f32.mrf.mxu3 }
 0x36e   : > { %1068 = vst [vmem:[%s1746_s26 + $0x20] sm:$0xff] %v1060_v32  ;;  %v932_v12 = vmax.f32 %v842_v58, %v904_v40  ;;  %v933_v20 = vmax.f32 %v843_v23, %v923_v60 }
 0x36f   : > { %1069 = vst [vmem:[%s1746_s26 + $0x28] sm:$0xff] %v1061_v33 }
 0x370   : > { %v1022_v63 = vmax.f32 %v932_v12, %v994_v29  ;;  %v1023_v0 = vmax.f32 %v933_v20, %v1013_v30 }
 0x372   : > { %v1054_v43 = vadd.f32 %v1046_v42, %v1022_v63  ;;  %v1055_v7 = vadd.f32 %v1046_v42, %v1023_v0 }
 0x374   : > { %v1062_v8 = vmax.f32 %v1054_v43, 0.0  ;;  %v1063_v44 = vmax.f32 %v1055_v7, 0.0 }
 0x376   : > { %1070 = vst [vmem:[%s1746_s26 + $0x30] sm:$0xff] %v1062_v8 }
 0x377   : > { %1071 = vst [vmem:[%s1746_s26 + $0x38] sm:$0xff] %v1063_v44 }
 0x378 PF: > { %s15_s20 = sadd.s32 1, %s1293_s20   ;;  %s1789_s18 = smov %s1289_s19 }
 0x379   : > { %p12_p5 = scmp.ge.s32.totalorder %s15_s20, 4   ;;  %s1790_s19 = smov %s1792_s21 }
 0x37b   :  { %14 = sbr.rel (!%p12_p5) target bundleno = 2 (0x2), region = 77 }

</bundles_post_ra>
